<compile_context>
chip_gen: v7x
topology: tpu7x:2x2x1
jax: 0.10.0
libtpu: 0.0.40
codegen_flags: <defaults>
</compile_context>

<pallas_src>
import functools
import math

import jax
import jax.numpy as jnp
from jax import lax
from jax.experimental import pallas as pl
from jax.experimental.pallas import tpu as pltpu


def _round_up(x, m):
    return (x + m - 1) // m * m


def _attn_kernel(q_ref, k_ref, v_ref, mask_ref,
                 wqt_ref, bq_ref, wkt_ref, bk_ref,
                 out_ref, *, scale, s2_valid):
    """One grid step processes `block_b` batch elements.

    q_ref    : (Bb, S1p, Dmp)   activations (bf16 by default, or f32)
    k_ref    : (Bb, S2p, Dmp)
    v_ref    : (Bb, S2p, Ep)
    mask_ref : (Bb, 1,  S2p)    int32, 0 == masked (padded key cols are 0 too)
    wqt_ref  : (Dmp, dkp)       W_q^T   (x @ W^T == x @ wqt)
    bq_ref   : (1,  dkp)        f32
    wkt_ref  : (Dmp, dkp)       W_k^T
    bk_ref   : (1,  dkp)        f32
    out_ref  : (Bb, S1p, Ep)    f32
    """
    Bb, S1p, Dmp = q_ref.shape
    S2p = k_ref.shape[1]
    dkp = wqt_ref.shape[1]
    mxu_dt = q_ref.dtype                     # bf16 (default) or f32

    # ---- linear projections: one big MXU matmul over all Bb*S rows (f32 acc) ----
    xq = q_ref[...].reshape(Bb * S1p, Dmp)
    xk = k_ref[...].reshape(Bb * S2p, Dmp)
    q = jnp.dot(xq, wqt_ref[...], preferred_element_type=jnp.float32) + bq_ref[...]
    k = jnp.dot(xk, wkt_ref[...], preferred_element_type=jnp.float32) + bk_ref[...]

    # Scale the (rows, d_k) q tile instead of the (S1, S2) scores tile: ~S2/d_k
    # fewer VALU ops, and a constant multiply instead of a divide.
    q = q * jnp.float32(scale)

    q3 = q.reshape(Bb, S1p, dkp).astype(mxu_dt)
    k3 = k.reshape(Bb, S2p, dkp).astype(mxu_dt)

    # ---- scores = q @ k^T : contract last dims directly, no k transpose ----
    scores = lax.dot_general(
        q3, k3,
        dimension_numbers=(((2,), (2,)), ((0,), (0,))),
        preferred_element_type=jnp.float32)               # (Bb, S1p, S2p) f32

    # masked_fill(mask == 0, -1e9); (Bb,1,S2p) broadcasts over the query axis.
    scores = jnp.where(mask_ref[...] != 0, scores, jnp.float32(-1.0e9))
    if s2_valid != S2p:
        # Exclude padded key columns *exactly* (-inf => exp == 0), so even a
        # fully-masked row keeps the reference's uniform-over-real-keys p_attn.
        col = lax.broadcasted_iota(jnp.int32, scores.shape, dimension=2)
        scores = jnp.where(col < s2_valid, scores, jnp.float32(-jnp.inf))

    # ---- softmax over keys, all in f32; reciprocal on the EUP (not a VALU div) ----
    s_max = jnp.max(scores, axis=-1, keepdims=True)
    p = jnp.exp(scores - s_max)
    denom = jnp.sum(p, axis=-1, keepdims=True)            # >= 1, reciprocal safe
    p = p * pl.reciprocal(denom, approx=True)
    # TODO(synk): torch.nn.Dropout(p=0.1) on p_attn omitted (identity in eval mode).

    # ---- out = p @ v : batched contraction over the key axis ----
    out = lax.dot_general(
        p.astype(mxu_dt), v_ref[...],
        dimension_numbers=(((2,), (1,)), ((0,), (0,))),
        preferred_element_type=jnp.float32)                # (Bb, S1p, Ep)
    out_ref[...] = out.astype(out_ref.dtype)


def single_headed_attention(query, key, value, mask, w_q, b_q, w_k, b_k,
                            *, block_b=None, use_bf16_matmul=True,
                            vmem_limit_bytes=None):
    """query: (B,S1,Dm)  key: (B,S2,Dm)  value: (B,S2,E)  mask: (B,1,S2)
    w_q/w_k: (d_k, Dm) torch-Linear weight layout, b_q/b_k: (d_k,)."""
    B, S1, Dm = query.shape
    S2 = key.shape[1]
    E = value.shape[2]
    d_k = w_q.shape[0]

    # Batch several examples per grid step (amortizes ~0.35us/step overhead and
    # fuses the projections into one big matmul), but keep >=2 parallel grid
    # steps whenever B >= 2 so both v7x TensorCores get work.
    if block_b is None:
        block_b = max(1, B // 2) if B > 1 else 1
    block_b = max(1, min(block_b, B))

    # Lane/sublane-friendly padded sizes (zero padding preserves exact results).
    s1_mult = 16 if use_bf16_matmul else 8
    S1p = _round_up(S1, s1_mult)
    S2p = _round_up(S2, 128)      # lane dim of scores/p, contraction of p@v
    Dmp = _round_up(Dm, 128)      # lane dim of x, contraction of projections
    dkp = _round_up(d_k, 128)     # lane dim of q/k, contraction of q@k^T
    Ep = _round_up(E, 128)        # lane dim of v and of the OUTPUT (dense vst)
    Bp = _round_up(B, block_b)

    act_dt = jnp.bfloat16 if use_bf16_matmul else jnp.float32

    def pad_to(x, shape):
        pads = [(0, t - s) for s, t in zip(x.shape, shape)]
        return jnp.pad(x, pads) if any(p[1] for p in pads) else x

    # MXU operands (activations, weights) in act_dt -> halves HBM/DMA bytes when
    # bf16; biases + softmax math stay f32 everywhere.
    q_p = pad_to(query.astype(act_dt), (Bp, S1p, Dmp))
    k_p = pad_to(key.astype(act_dt), (Bp, S2p, Dmp))
    v_p = pad_to(value.astype(act_dt), (Bp, S2p, Ep))
    # TODO(synk): mask could be shipped as int8/bool to cut its DMA bytes 4x (minor).
    m_p = pad_to(mask.astype(jnp.int32), (Bp, 1, S2p))     # padded keys -> mask 0
    wqt = pad_to(jnp.asarray(w_q, jnp.float32).T.astype(act_dt), (Dmp, dkp))
    wkt = pad_to(jnp.asarray(w_k, jnp.float32).T.astype(act_dt), (Dmp, dkp))
    bq2 = pad_to(jnp.asarray(b_q, jnp.float32).reshape(1, d_k), (1, dkp))
    bk2 = pad_to(jnp.asarray(b_k, jnp.float32).reshape(1, d_k), (1, dkp))

    kernel = functools.partial(_attn_kernel,
                               scale=1.0 / math.sqrt(d_k),
                               s2_valid=S2)

    # TODO(synk): for production sequence lengths, add an "arbitrary" S2-tile grid
    # axis with an online-softmax (m/l/acc VMEM scratch) instead of holding the
    # full (S1,S2) scores tile — mandatory on v7x (64 MiB VMEM), advisable on v5e.
    out_p = pl.pallas_call(
        kernel,
        out_shape=jax.ShapeDtypeStruct((Bp, S1p, Ep), jnp.float32),
        grid_spec=pltpu.PrefetchScalarGridSpec(
            num_scalar_prefetch=0,
            grid=(Bp // block_b,),
            in_specs=[
                pl.BlockSpec((block_b, S1p, Dmp), lambda b: (b, 0, 0)),   # query
                pl.BlockSpec((block_b, S2p, Dmp), lambda b: (b, 0, 0)),   # key
                pl.BlockSpec((block_b, S2p, Ep), lambda b: (b, 0, 0)),    # value
                pl.BlockSpec((block_b, 1, S2p), lambda b: (b, 0, 0)),     # mask
                pl.BlockSpec((Dmp, dkp), lambda b: (0, 0)),               # Wq^T
                pl.BlockSpec((1, dkp), lambda b: (0, 0)),                 # bq
                pl.BlockSpec((Dmp, dkp), lambda b: (0, 0)),               # Wk^T
                pl.BlockSpec((1, dkp), lambda b: (0, 0)),                 # bk
            ],
            out_specs=pl.BlockSpec((block_b, S1p, Ep), lambda b: (b, 0, 0)),
        ),
        compiler_params=pltpu.CompilerParams(
            dimension_semantics=("parallel",),
            vmem_limit_bytes=vmem_limit_bytes),
    )(q_p, k_p, v_p, m_p, wqt, bq2, wkt, bk2)

    return out_p[:B, :S1, :E]


def _reference(query, key, value, mask, w_q, b_q, w_k, b_k):
    """Pure-JAX f32 reference reproducing the PyTorch forward (dropout = identity)."""
    q = query @ w_q.T + b_q
    k = key @ w_k.T + b_k
    d_k = q.shape[-1]
    scores = jnp.einsum("bqd,bkd->bqk", q, k) / math.sqrt(d_k)
    scores = jnp.where(mask == 0, -1.0e9, scores)          # (B,1,S2) broadcasts
    p = jax.nn.softmax(scores, axis=-1)
    return jnp.einsum("bqk,bke->bqe", p, value)


if __name__ == "__main__":
    # small shapes consistent with the module's forward:
    B, S1, S2 = 2, 8, 8
    d_model, d_k, E = 32, 16, 32

    key0 = jax.random.PRNGKey(0)
    kq, kk, kv, kwq, kbq, kwk, kbk, km = jax.random.split(key0, 8)

    query = jax.random.normal(kq, (B, S1, d_model), jnp.float32)
    key_ = jax.random.normal(kk, (B, S2, d_model), jnp.float32)
    value = jax.random.normal(kv, (B, S2, E), jnp.float32)

    # deterministic "Linear(d_model, d_k)" parameters (synthetic init)
    bound = 1.0 / math.sqrt(d_model)
    w_q = jax.random.uniform(kwq, (d_k, d_model), jnp.float32, -bound, bound)
    b_q = jax.random.uniform(kbq, (d_k,), jnp.float32, -bound, bound)
    w_k = jax.random.uniform(kwk, (d_k, d_model), jnp.float32, -bound, bound)
    b_k = jax.random.uniform(kbk, (d_k,), jnp.float32, -bound, bound)

    # mask: (B, 1, S2), zeros mark padded key positions
    mask = (jax.random.uniform(km, (B, 1, S2)) > 0.25).astype(jnp.int32)

    ref = _reference(query, key_, value, mask, w_q, b_q, w_k, b_k)

    # f32 MXU path: structural exactness check (only the approx EUP reciprocal
    # differs from exact arithmetic).
    out_f32 = single_headed_attention(query, key_, value, mask, w_q, b_q, w_k, b_k,
                                      use_bf16_matmul=False)
    out_f32 = jax.block_until_ready(out_f32)
    assert out_f32.shape == (B, S1, E)
    assert jnp.allclose(out_f32, ref, atol=1e-2, rtol=1e-2), (
        "f32 path mismatch, max abs err = %s" % jnp.max(jnp.abs(out_f32 - ref)))

    # default path: bf16 MXU operands, f32 accumulation + f32 softmax.
    out_bf16 = single_headed_attention(query, key_, value, mask, w_q, b_q, w_k, b_k)
    out_bf16 = jax.block_until_ready(out_bf16)
    assert out_bf16.shape == (B, S1, E)
    assert jnp.allclose(out_bf16, ref, atol=3e-2, rtol=3e-2), (
        "bf16 path mismatch, max abs err = %s" % jnp.max(jnp.abs(out_bf16 - ref)))

    print("KERNEL_OK")
</pallas_src>

<mosaic_0001>
module attributes {stable_mosaic.version = 11 : i64} {
  func.func @_attn_kernel(%arg0: i32, %arg1: memref<1x8x128xf32, #tpu.memory_space<vmem>>, %arg2: memref<1x128x128xf32, #tpu.memory_space<vmem>>, %arg3: memref<1x128x128xf32, #tpu.memory_space<vmem>>, %arg4: memref<1x1x128xi32, #tpu.memory_space<vmem>>, %arg5: memref<128x128xf32, #tpu.memory_space<vmem>>, %arg6: memref<1x128xf32, #tpu.memory_space<vmem>>, %arg7: memref<128x128xf32, #tpu.memory_space<vmem>>, %arg8: memref<1x128xf32, #tpu.memory_space<vmem>>, %arg9: memref<1x8x128xf32, #tpu.memory_space<vmem>>) attributes {dimension_semantics = [#tpu.dimension_semantics<parallel>], iteration_bounds = array<i64: 2>, scalar_prefetch = 0 : i64, scratch_operands = 0 : i64, tpu.core_type = #tpu.core_type<tc>, window_params = [{transform_indices = @transform_0, window_bounds = array<i64: 1, 8, 128>}, {transform_indices = @transform_1, window_bounds = array<i64: 1, 128, 128>}, {transform_indices = @transform_2, window_bounds = array<i64: 1, 128, 128>}, {transform_indices = @transform_3, window_bounds = array<i64: 1, 1, 128>}, {pipeline_mode = #tpu.pipeline_mode<synchronous>, transform_indices = @transform_4, window_bounds = array<i64: 128, 128>}, {pipeline_mode = #tpu.pipeline_mode<synchronous>, transform_indices = @transform_5, window_bounds = array<i64: 1, 128>}, {pipeline_mode = #tpu.pipeline_mode<synchronous>, transform_indices = @transform_6, window_bounds = array<i64: 128, 128>}, {pipeline_mode = #tpu.pipeline_mode<synchronous>, transform_indices = @transform_7, window_bounds = array<i64: 1, 128>}, {transform_indices = @transform_8, window_bounds = array<i64: 1, 8, 128>}]} {
    %c0 = arith.constant 0 : index
    %c0_0 = arith.constant 0 : index
    %c0_1 = arith.constant 0 : index
    %0 = vector.load %arg1[%c0, %c0_0, %c0_1] : memref<1x8x128xf32, #tpu.memory_space<vmem>>, vector<1x8x128xf32>
    %1 = vector.shape_cast %0 : vector<1x8x128xf32> to vector<8x128xf32>
    %c0_2 = arith.constant 0 : index
    %c0_3 = arith.constant 0 : index
    %c0_4 = arith.constant 0 : index
    %2 = vector.load %arg2[%c0_2, %c0_3, %c0_4] : memref<1x128x128xf32, #tpu.memory_space<vmem>>, vector<1x128x128xf32>
    %3 = vector.shape_cast %2 : vector<1x128x128xf32> to vector<128x128xf32>
    %c0_5 = arith.constant 0 : index
    %c0_6 = arith.constant 0 : index
    %4 = vector.load %arg5[%c0_5, %c0_6] : memref<128x128xf32, #tpu.memory_space<vmem>>, vector<128x128xf32>
    %cst = arith.constant dense<0.000000e+00> : vector<8x128xf32>
    %5 = tpu.matmul %1, %4, %cst {dimension_numbers = #tpu.dot_dimension_numbers<[1], [0], [0], [1], [0, 0, 1, 1], [], []>} : vector<8x128xf32>, vector<128x128xf32>, vector<8x128xf32> -> vector<8x128xf32>
    %c0_7 = arith.constant 0 : index
    %c0_8 = arith.constant 0 : index
    %6 = vector.load %arg6[%c0_7, %c0_8] : memref<1x128xf32, #tpu.memory_space<vmem>>, vector<1x128xf32>
    %7 = vector.broadcast %6 : vector<1x128xf32> to vector<8x128xf32>
    %8 = arith.addf %5, %7 : vector<8x128xf32>
    %c0_9 = arith.constant 0 : index
    %c0_10 = arith.constant 0 : index
    %9 = vector.load %arg7[%c0_9, %c0_10] : memref<128x128xf32, #tpu.memory_space<vmem>>, vector<128x128xf32>
    %cst_11 = arith.constant dense<0.000000e+00> : vector<128x128xf32>
    %10 = tpu.matmul %3, %9, %cst_11 {dimension_numbers = #tpu.dot_dimension_numbers<[1], [0], [0], [1], [0, 0, 1, 1], [], []>} : vector<128x128xf32>, vector<128x128xf32>, vector<128x128xf32> -> vector<128x128xf32>
    %c0_12 = arith.constant 0 : index
    %c0_13 = arith.constant 0 : index
    %11 = vector.load %arg8[%c0_12, %c0_13] : memref<1x128xf32, #tpu.memory_space<vmem>>, vector<1x128xf32>
    %12 = vector.broadcast %11 : vector<1x128xf32> to vector<128x128xf32>
    %13 = arith.addf %10, %12 : vector<128x128xf32>
    %cst_14 = arith.constant 2.500000e-01 : f32
    %14 = vector.broadcast %cst_14 : f32 to vector<8x128xf32>
    %15 = arith.mulf %8, %14 : vector<8x128xf32>
    %16 = vector.shape_cast %15 : vector<8x128xf32> to vector<1x8x128xf32>
    %17 = vector.shape_cast %13 : vector<128x128xf32> to vector<1x128x128xf32>
    %cst_15 = arith.constant dense<0.000000e+00> : vector<1x8x128xf32>
    %18 = tpu.matmul %16, %17, %cst_15 {dimension_numbers = #tpu.dot_dimension_numbers<[2], [2], [1], [1], [0, 0, 0, 1, 1, 1], [0], [0]>} : vector<1x8x128xf32>, vector<1x128x128xf32>, vector<1x8x128xf32> -> vector<1x8x128xf32>
    %c0_16 = arith.constant 0 : index
    %c0_17 = arith.constant 0 : index
    %c0_18 = arith.constant 0 : index
    %19 = vector.load %arg4[%c0_16, %c0_17, %c0_18] : memref<1x1x128xi32, #tpu.memory_space<vmem>>, vector<1x1x128xi32>
    %c0_i32 = arith.constant 0 : i32
    %20 = vector.broadcast %c0_i32 : i32 to vector<1x1x128xi32>
    %21 = arith.cmpi ne, %19, %20 : vector<1x1x128xi32>
    %cst_19 = arith.constant -1.000000e+09 : f32
    %22 = vector.shape_cast %21 : vector<1x1x128xi1> to vector<1x1x128xi1>
    %23 = vector.broadcast %22 : vector<1x1x128xi1> to vector<1x8x128xi1>
    %24 = vector.broadcast %cst_19 : f32 to vector<1x8x128xf32>
    %25 = arith.select %23, %18, %24 : vector<1x8x128xi1>, vector<1x8x128xf32>
    %26 = tpu.iota {dimensions = array<i32: 2>} : vector<1x8x128xi32>
    %c8_i32 = arith.constant 8 : i32
    %27 = vector.broadcast %c8_i32 : i32 to vector<1x8x128xi32>
    %28 = arith.cmpi slt, %26, %27 : vector<1x8x128xi32>
    %cst_20 = arith.constant 0xFF800000 : f32
    %29 = vector.broadcast %cst_20 : f32 to vector<1x8x128xf32>
    %30 = arith.select %28, %25, %29 : vector<1x8x128xi1>, vector<1x8x128xf32>
    %cst_21 = arith.constant dense<0xFF800000> : vector<1x8xf32>
    %31 = vector.multi_reduction <maximumf>, %30, %cst_21 [2] : vector<1x8x128xf32> to vector<1x8xf32>
    %32 = vector.shape_cast %31 : vector<1x8xf32> to vector<1x8x1xf32>
    %33 = vector.broadcast %32 : vector<1x8x1xf32> to vector<1x8x128xf32>
    %34 = arith.subf %30, %33 : vector<1x8x128xf32>
    %35 = math.exp %34 : vector<1x8x128xf32>
    %cst_22 = arith.constant dense<0.000000e+00> : vector<1x8xf32>
    %36 = vector.multi_reduction <add>, %35, %cst_22 [2] : vector<1x8x128xf32> to vector<1x8xf32>
    %37 = vector.shape_cast %36 : vector<1x8xf32> to vector<1x8x1xf32>
    %38 = tpu.reciprocal %37 {approx = true} : vector<1x8x1xf32> -> vector<1x8x1xf32>
    %39 = vector.broadcast %38 : vector<1x8x1xf32> to vector<1x8x128xf32>
    %40 = arith.mulf %35, %39 : vector<1x8x128xf32>
    %c0_23 = arith.constant 0 : index
    %c0_24 = arith.constant 0 : index
    %c0_25 = arith.constant 0 : index
    %41 = vector.load %arg3[%c0_23, %c0_24, %c0_25] : memref<1x128x128xf32, #tpu.memory_space<vmem>>, vector<1x128x128xf32>
    %cst_26 = arith.constant dense<0.000000e+00> : vector<1x8x128xf32>
    %42 = tpu.matmul %40, %41, %cst_26 {dimension_numbers = #tpu.dot_dimension_numbers<[2], [1], [1], [2], [0, 0, 0, 1, 1, 2], [0], [0]>} : vector<1x8x128xf32>, vector<1x128x128xf32>, vector<1x8x128xf32> -> vector<1x8x128xf32>
    %c0_27 = arith.constant 0 : index
    %c0_28 = arith.constant 0 : index
    %c0_29 = arith.constant 0 : index
    %43 = vector.load %arg9[%c0_27, %c0_28, %c0_29] : memref<1x8x128xf32, #tpu.memory_space<vmem>>, vector<1x8x128xf32>
    tpu.vector_store %arg9[%c0_27, %c0_28, %c0_29], %42 {strides = array<i32>} : memref<1x8x128xf32, #tpu.memory_space<vmem>>, vector<1x8x128xf32>,
    return
  }
  func.func @transform_0(%arg0: i32) -> (i32, i32, i32) {
    %c0_i32 = arith.constant 0 : i32
    %c0_i32_0 = arith.constant 0 : i32
    %c0_i32_1 = arith.constant 0 : i32
    return %arg0, %c0_i32, %c0_i32_0 : i32, i32, i32
  }
  func.func @transform_1(%arg0: i32) -> (i32, i32, i32) {
    %c0_i32 = arith.constant 0 : i32
    %c0_i32_0 = arith.constant 0 : i32
    %c0_i32_1 = arith.constant 0 : i32
    return %arg0, %c0_i32, %c0_i32_0 : i32, i32, i32
  }
  func.func @transform_2(%arg0: i32) -> (i32, i32, i32) {
    %c0_i32 = arith.constant 0 : i32
    %c0_i32_0 = arith.constant 0 : i32
    %c0_i32_1 = arith.constant 0 : i32
    return %arg0, %c0_i32, %c0_i32_0 : i32, i32, i32
  }
  func.func @transform_3(%arg0: i32) -> (i32, i32, i32) {
    %c0_i32 = arith.constant 0 : i32
    %c0_i32_0 = arith.constant 0 : i32
    %c0_i32_1 = arith.constant 0 : i32
    return %arg0, %c0_i32, %c0_i32_0 : i32, i32, i32
  }
  func.func @transform_4(%arg0: i32) -> (i32, i32) {
    %c0_i32 = arith.constant 0 : i32
    %c0_i32_0 = arith.constant 0 : i32
    %c0_i32_1 = arith.constant 0 : i32
    return %c0_i32, %c0_i32_0 : i32, i32
  }
  func.func @transform_5(%arg0: i32) -> (i32, i32) {
    %c0_i32 = arith.constant 0 : i32
    %c0_i32_0 = arith.constant 0 : i32
    %c0_i32_1 = arith.constant 0 : i32
    return %c0_i32, %c0_i32_0 : i32, i32
  }
  func.func @transform_6(%arg0: i32) -> (i32, i32) {
    %c0_i32 = arith.constant 0 : i32
    %c0_i32_0 = arith.constant 0 : i32
    %c0_i32_1 = arith.constant 0 : i32
    return %c0_i32, %c0_i32_0 : i32, i32
  }
  func.func @transform_7(%arg0: i32) -> (i32, i32) {
    %c0_i32 = arith.constant 0 : i32
    %c0_i32_0 = arith.constant 0 : i32
    %c0_i32_1 = arith.constant 0 : i32
    return %c0_i32, %c0_i32_0 : i32, i32
  }
  func.func @transform_8(%arg0: i32) -> (i32, i32, i32) {
    %c0_i32 = arith.constant 0 : i32
    %c0_i32_0 = arith.constant 0 : i32
    %c0_i32_1 = arith.constant 0 : i32
    return %arg0, %c0_i32, %c0_i32_0 : i32, i32, i32
  }
}

</mosaic_0001>

<bundles_post_ra>
// kernel: tpu_custom_call.1
= control target key start
LH: loop header
LB: loop body
LE: loop exit
PB: predicated region body
PF: predicated region fallthrough
CT: control target
= control target key end

     0   :  { %s2190_s0 = inlined_call_operand.hbm [shape: f32[2,8,128], index: 0, kind: input, shape index: {}]   ;;  %s2191_s1 = inlined_call_operand.hbm [shape: f32[2,128,128], index: 1, kind: input, shape index: {}]   ;;  %s2192_s2 = inlined_call_operand.hbm [shape: f32[2,128,128], index: 2, kind: input, shape index: {}]   ;;  %s2193_s3 = inlined_call_operand.vmem [shape: s32[2,1,128], index: 3, kind: input, shape index: {}]   ;;  %s2194_s4 = inlined_call_operand.hbm [shape: f32[128,128], index: 4, kind: input, shape index: {}]   ;;  %s2195_s5 = inlined_call_operand.vmem [shape: f32[1,128], index: 5, kind: input, shape index: {}]   ;;  %s2196_s6 = inlined_call_operand.hbm [shape: f32[128,128], index: 6, kind: input, shape index: {}]   ;;  %s2197_s7 = inlined_call_operand.vmem [shape: f32[1,128], index: 7, kind: input, shape index: {}]   ;;  %s2198_s8 = inlined_call_operand.hbm [shape: f32[2,8,128], index: 8, kind: output, shape index: {}]  }
   0x1   :  { %2222 = sst [smem:[#allocation22_spill]] %s2191_s1 }
   0x2   :  { %2223 = sst [smem:[#allocation23_spill]] %s2193_s3 }
   0x3   :  { %2224 = sst [smem:[#allocation24_spill]] %s2194_s4 }
   0x4   :  { %2225 = sst [smem:[#allocation25_spill]] %s2195_s5 }
   0x5   :  { %2226 = sst [smem:[#allocation26_spill]] %s2198_s8 }
   0x6   :  { %13 = vsyncpa [#allocation3], 0 }
   0x7   :  { %15 = vsyncpa [#allocation3 + $0x1], 0 }
   0x8   :  { %16 = vsyncpa [#allocation6], 0 }
   0x9   :  { %18 = vsyncpa [#allocation6 + $0x1], 0 }
   0xa   :  { %19 = vsyncpa [#allocation9], 0 }
   0xb   :  { %20 = vsyncpa [#allocation4], 0 }
   0xc   :  { %22 = vsyncpa [#allocation4 + $0x1], 0  ;;  %s1796_s27 = smov 0   ;;  %s1798_s28 = smov 0  }
   0xd   :  { %s1800_s29 = smov 0   ;;  %s1802_s30 = smov 0  }
   0xe LB: > { %2227 = sst [smem:[#allocation16_spill]] %s1725_s27  ;;  %s1817_s9 = sadd.s32 4294967295, %s1737_s30   ;;  %s1737_s30 = sphi %s1802_s30, %s2267_s30   ;;  %s1733_s29 = sphi %s1800_s29, %s2269_s29   ;;  %s1729_s28 = sphi %s1798_s28, %s2271_s28   ;;  %s1725_s27 = sphi %s1796_s27, %s2270_s27  }
   0xf   : > { %2228 = sst [smem:[#allocation17_spill]] %s1733_s29  ;;  %s1054_s10 = sadd.s32 4294967294, %s1737_s30  }
  0x10   : > { %s1821_s11 = sadd.s32 1, %s1737_s30   ;;  %s35_s12 = sadd.s32 1, %s1733_s29 }
  0x11   : > { %2229 = sst [smem:[#allocation18_spill]] %s1821_s11  ;;  %s32_s13 = ssub.s32 %s1737_s30, %s1821_s11 }
  0x12   : > { %p42_p0 = scmp.ne.s32.totalorder %s1733_s29, %s1729_s28  ;;  %p33_p1 = scmp.eq.s32.totalorder %s32_s13, 0 }
  0x13   : > { %p43_p2 = scmp.eq.s32.totalorder %s1737_s30, 0  ;;  %p48_p3 = scmp.ne.s32.totalorder %s1729_s28, %s1725_s27 }
  0x14   : > { %p2200_p4 = scmp.eq.s32.totalorder %s1817_s9, 0  ;;  %p234_p7 = scmp.eq.s32.totalorder %s1817_s9, 1 }
  0x15   : > { %s1833_s14 = scalar_select %p33_p1, %s1733_s29, %s35_s12  }
  0x16   : > { %p1835_p5 = por %p43_p2, %p42_p0  ;;  %p1841_p6 = por %p2200_p4, %p48_p3 }
  0x17   : > { %2230 = sst [smem:[#allocation19_spill]] %s1833_s14  ;;  %p240_p8 = scmp.eq.s32.totalorder %s1054_s10, 1 }
  0x18   : > { %s2231_s15 = scalar_select %p1835_p5, 1, 0 }
  0x19   : > { %s2232_s16 = scalar_select %p1841_p6, 1, 0 }
  0x1a   : > { %p1055_p9 = scmp.ge.s32.totalorder %s1737_s30, 1  ;;  %p247_p10 = scmp.lt.s32.totalorder %s1737_s30, 3 }
  0x1b   : > { %p1848_p11 = por %p234_p7, %p42_p0  ;;  %p1852_p12 = por %p240_p8, %p48_p3 }
  0x1c   : > { %p1856_p13 = pnand %p1055_p9, %p247_p10  ;;  %s1739_s20 = smov [#allocation8]  }
  0x1d   : > { %s2233_s17 = scalar_select %p1848_p11, 1, 0 }
  0x1e   : > { %s2235_s18 = scalar_select %p1852_p12, 1, 0 }
  0x1f   : > { %2234 = sst [smem:[#allocation20_spill]] %s2233_s17  ;;  %p1446_p1 = pneg %p1856_p13 }
  0x20   : > { %2236 = sst [smem:[#allocation21_spill]] %s2235_s18  ;;  %s259_s21 = sshll.u32 %s1739_s20, 4  ;;  %s260_s21 = int_to_ptr.vmem [resolvable:$true] %s259_s21 }
  0x21   : > { %s2237_s19 = scalar_select %p1856_p13, 1, 0 }
  0x22   : > { %p1864_p2 = pnand %p1446_p1, %p2200_p4  ;;  %s1871_s23 = sand.u32 1, %s1733_s29  }
  0x23   : > { %s310_s24 = sand.u32 1, %s1737_s30   ;;  %s2239_s4 = sld [smem:[#allocation24_spill]] }
  0x24   : > { %s2238_s22 = scalar_select %p1864_p2, 1, 0 }
  0x25   : > { %p2211_p8 = pneg %p1864_p2 }
  0x29   : > { %s1517_s10 = scalar_lea.hbm %s2239_s4, 2048 }
  0x2a   : > { %p1518_p7 = scmp.ne.s32.totalorder %s2239_s4, %s1517_s10  ;;  %p1524_p1 = scmp.lt.u32.totalorder %s1517_s10, %s2239_s4 }
  0x2c   : > { %p1520_p9 = pnand %p2211_p8, %p1518_p7 }
  0x2e   : > { %p1521_p10 = pneg %p1520_p9 }
  0x30   : > { %p1526_p0 = pnand %p1524_p1, %p1521_p10 }
  0x32   : > { %1529 = shalt.err (!%p1526_p0)
}
  0x33   : > { %s1530_s29 = scalar_lea.vmem %s260_s21, 2048  ;;  %p1538_p11 = scmp.lt.s32.totalorder %s260_s21, %s260_s21 }
  0x34   : > { %p1531_p4 = scmp.ne.s32.totalorder %s260_s21, %s1530_s29  ;;  %p1539_p6 = scmp.lt.s32.totalorder %s1530_s29, %s1530_s29 }
  0x36   : > { %p1533_p3 = pnand %p1531_p4, %p2211_p8  ;;  %p1540_p13 = por %p1539_p6, %p1538_p11 }
  0x38   : > { %p1534_p12 = pneg %p1533_p3 }
  0x3a   : > { %p1541_p5 = pnand %p1540_p13, %p1534_p12 }
  0x3c   : > { %1544 = shalt.err (!%p1541_p5)
}
  0x3d   : > { %s2207_s25 = smov 128   ;;  %s1741_s14 = smov 8  }
  0x3e   : > { %1449 = dma.hbm_to_vmem [thread:$0]  (!%p1864_p2), %s2239_s4, 2048, %s260_s21, [#allocation9], %s2207_s25, %s2207_s25, %s1741_s14  }
  0x3f   : > { %p2240_p4 = scmp.ne.s32.totalorder %s2231_s15, 0  ;;  %p2241_p6 = scmp.lt.s32.totalorder %s1737_s30, 2 }
  0x40   : > { %s2209_s12 = sshll.u32 %s1871_s23, 7  ;;  %s2210_s13 = sshll.u32 %s1737_s30, 11 }
  0x41   : > { %p1903_p5 = pnand %p2241_p6, %p2240_p4  ;;  %s2243_s1 = sld [smem:[#allocation22_spill]] }
  0x42   : > { %s314_s15 = scalar_lea.vmem [#allocation5], %s2209_s12  ;;  %s1920_s26 = scalar_lea.sflag [#allocation6], %s310_s24 }
  0x43   : > { %s2242_s29 = scalar_select %p1903_p5, 1, 0 }
  0x44   : > { %s321_s21 = sshll.u32 %s314_s15, 4  ;;  %p1926_p12 = pneg %p1903_p5  ;;  %s1918_s21 = int_to_ptr.vmem [resolvable:$true] %s321_s21 }
  0x46   : > { %s2244_s25 = scalar_select %p1926_p12, 1, 0 }
  0x47   : > { %s1914_s18 = scalar_lea.hbm %s2243_s1, %s2210_s13  ;;  %s1550_s12 = scalar_lea.hbm %s2243_s1, 4096 }
  0x48   : > { %s1545_s10 = scalar_lea.hbm %s1914_s18, 2048  ;;  %p1551_p3 = scmp.lt.u32.totalorder %s1914_s18, %s2243_s1 }
  0x49   : > { %p1546_p11 = scmp.ne.s32.totalorder %s1914_s18, %s1545_s10  ;;  %p1552_p7 = scmp.lt.u32.totalorder %s1550_s12, %s1545_s10 }
  0x4a   : > { %p1554_p10 = scmp.lt.u32.totalorder %s1545_s10, %s1914_s18 }
  0x4b   : > { %p1548_p13 = pnand %p1926_p12, %p1546_p11  ;;  %p1553_p9 = por %p1552_p7, %p1551_p3 }
  0x4d   : > { %p1549_p0 = pneg %p1548_p13  ;;  %p1555_p1 = por %p1554_p10, %p1553_p9 }
  0x4f   : > { %p1556_p4 = pnand %p1555_p1, %p1549_p0 }
  0x51   : > { %1559 = shalt.err (!%p1556_p4)
}
  0x52   : > { %s1560_s24 = scalar_lea.vmem %s1918_s21, 2048  ;;  %s1742_s11 = smov [#allocation5]  }
  0x53   : > { %p1561_p6 = scmp.ne.s32.totalorder %s1918_s21, %s1560_s24  ;;  %s1565_s20 = sshll.u32 %s1742_s11, 4  ;;  %s1566_s20 = int_to_ptr.vmem [resolvable:$false] %s1565_s20 }
  0x54   : > { %s1567_s13 = scalar_lea.vmem %s1566_s20, 4096  ;;  %p1568_p8 = scmp.lt.s32.totalorder %s1918_s21, %s1566_s20 }
  0x55   : > { %p1563_p11 = pnand %p1561_p6, %p1926_p12  ;;  %p1569_p2 = scmp.lt.s32.totalorder %s1567_s13, %s1560_s24 }
  0x57   : > { %p1564_p13 = pneg %p1563_p11  ;;  %p1570_p3 = por %p1569_p2, %p1568_p8 }
  0x59   : > { %p1571_p7 = pnand %p1570_p3, %p1564_p13 }
  0x5b   : > { %1574 = shalt.err (!%p1571_p7)
}
  0x5c   : > { %s2245_s12 = smov 128   ;;  %s2246_s10 = sshll.u32 %s1737_s30, 11 }
  0x5d   : > { %1459 = dma.hbm_to_vmem [thread:$0]  (!%p1903_p5), %s1914_s18, 2048, %s1918_s21, %s1920_s26, %s2245_s12, %s2245_s12, %s1741_s14  }
  0x5e   : > { %s1958_s24 = scalar_lea.hbm %s2192_s2, %s2246_s10  ;;  %s2247_s20 = sshll.u32 %s1871_s23, 7 }
  0x5f   : > { %s335_s13 = scalar_lea.vmem [#allocation7], %s2247_s20  ;;  %s1743_s4 = smov [#allocation10]  }
  0x60   : > { %s342_s1 = sshll.u32 %s335_s13, 4  ;;  %s275_s27 = sshll.u32 %s1743_s4, 4  ;;  %s1962_s1 = int_to_ptr.vmem [resolvable:$true] %s342_s1  ;;  %s276_s27 = int_to_ptr.vmem [resolvable:$true] %s275_s27 }
  0x61   : > { %s1059_s8 = sshll.u32 %s1871_s23, 3  ;;  %s1575_s5 = scalar_lea.hbm %s2196_s6, 2048 }
  0x62   : > { %p1576_p2 = scmp.ne.s32.totalorder %s2196_s6, %s1575_s5  ;;  %p2248_p8 = scmp.ne.s32.totalorder %s2238_s22, 0 }
  0x63   : > { %p1582_p1 = scmp.lt.u32.totalorder %s1575_s5, %s2196_s6 }
  0x64   : > { %p2249_p0 = pneg %p2248_p8 }
  0x66   : > { %p1578_p9 = pnand %p1576_p2, %p2249_p0 }
  0x68   : > { %p1579_p10 = pneg %p1578_p9 }
  0x6a   : > { %p1584_p4 = pnand %p1582_p1, %p1579_p10 }
  0x6c   : > { %1587 = shalt.err (!%p1584_p4)
}
  0x6d   : > { %s1588_s4 = scalar_lea.vmem %s276_s27, 2048  ;;  %p2250_p11 = pmov %p2249_p0 }
  0x6e   : > { %p1589_p6 = scmp.ne.s32.totalorder %s276_s27, %s1588_s4  ;;  %p1596_p7 = scmp.lt.s32.totalorder %s276_s27, %s276_s27 }
  0x6f   : > { %p1597_p5 = scmp.lt.s32.totalorder %s1588_s4, %s1588_s4 }
  0x70   : > { %p1591_p13 = pnand %p1589_p6, %p2250_p11 }
  0x71   : > { %p1598_p12 = por %p1597_p5, %p1596_p7 }
  0x72   : > { %p1592_p3 = pneg %p1591_p13 }
  0x74   : > { %p1599_p0 = pnand %p1598_p12, %p1592_p3 }
  0x76   : > { %1602 = shalt.err (!%p1599_p0)
}
  0x77   : > { %1452 = dma.hbm_to_vmem [thread:$0]  (!%p2248_p8), %s2196_s6, 2048, %s276_s27, [#allocation9], %s2245_s12, %s2245_s12, %s1741_s14  }
  0x78   : > { %s1060_s17 = sshll.u32 %s1737_s30, 7  ;;  %s296_s22 = scalar_lea.vmem [#allocation2], %s1059_s8 }
  0x79   : > { %s1992_s13 = scalar_lea.hbm %s2190_s0, %s1060_s17  ;;  %s303_s18 = sshll.u32 %s296_s22, 4  ;;  %s304_s18 = int_to_ptr.vmem [resolvable:$true] %s303_s18 }
  0x7a   : > { %s293_s21 = scalar_lea.sflag [#allocation3], %s1871_s23  ;;  %s1603_s10 = scalar_lea.hbm %s1992_s13, 128 }
  0x7b   : > { %p1604_p5 = scmp.ne.s32.totalorder %s1992_s13, %s1603_s10  ;;  %p2251_p12 = scmp.ne.s32.totalorder %s2244_s25, 0 }
  0x7c   : > { %s1608_s4 = scalar_lea.hbm %s2190_s0, 256  ;;  %p1609_p8 = scmp.lt.u32.totalorder %s1992_s13, %s2190_s0 }
  0x7d   : > { %p1606_p2 = pnand %p1604_p5, %p2251_p12  ;;  %p1610_p10 = scmp.lt.u32.totalorder %s1608_s4, %s1603_s10 }
  0x7e   : > { %p1612_p4 = scmp.lt.u32.totalorder %s1603_s10, %s1992_s13 }
  0x7f   : > { %p1607_p9 = pneg %p1606_p2  ;;  %p1611_p1 = por %p1610_p10, %p1609_p8 }
  0x81   : > { %p1613_p6 = por %p1612_p4, %p1611_p1 }
  0x83   : > { %p1614_p11 = pnand %p1613_p6, %p1607_p9 }
  0x85   : > { %1617 = shalt.err (!%p1614_p11)
}
  0x86   : > { %s1618_s8 = scalar_lea.vmem %s304_s18, 128  ;;  %s1744_s23 = smov [#allocation2]  }
  0x87   : > { %p1619_p13 = scmp.ne.s32.totalorder %s304_s18, %s1618_s8  ;;  %s1623_s17 = sshll.u32 %s1744_s23, 4  ;;  %s1624_s17 = int_to_ptr.vmem [resolvable:$false] %s1623_s17 }
  0x88   : > { %s1625_s11 = scalar_lea.vmem %s1624_s17, 256  ;;  %p1626_p0 = scmp.lt.s32.totalorder %s304_s18, %s1624_s17 }
  0x89   : > { %p1621_p3 = pnand %p1619_p13, %p2251_p12  ;;  %p1627_p5 = scmp.lt.s32.totalorder %s1625_s11, %s1618_s8 }
  0x8b   : > { %p1622_p7 = pneg %p1621_p3  ;;  %p1628_p2 = por %p1627_p5, %p1626_p0 }
  0x8d   : > { %p1629_p8 = pnand %p1628_p2, %p1622_p7 }
  0x8f   : > { %1632 = shalt.err (!%p1629_p8)
}
  0x90   : > { %p2252_p10 = scmp.ne.s32.totalorder %s2242_s29, 0  ;;  %s1633_s20 = scalar_lea.hbm %s1958_s24, 2048 }
  0x91   : > { %p1634_p9 = scmp.ne.s32.totalorder %s1958_s24, %s1633_s20  ;;  %s1638_s27 = scalar_lea.hbm %s2192_s2, 4096 }
  0x92   : > { %1456 = dma.hbm_to_vmem [thread:$0]  (!%p2252_p10), %s1992_s13, 128, %s304_s18, %s293_s21  }
  0x93   : > { %p1636_p1 = pnand %p1634_p9, %p2251_p12  ;;  %p1639_p6 = scmp.lt.u32.totalorder %s1958_s24, %s2192_s2 }
  0x94   : > { %p1640_p11 = scmp.lt.u32.totalorder %s1638_s27, %s1633_s20  ;;  %p1642_p3 = scmp.lt.u32.totalorder %s1633_s20, %s1958_s24 }
  0x95   : > { %p1637_p4 = pneg %p1636_p1 }
  0x96   : > { %p1641_p13 = por %p1640_p11, %p1639_p6 }
  0x98   : > { %p1643_p7 = por %p1642_p3, %p1641_p13 }
  0x9a   : > { %p1644_p0 = pnand %p1643_p7, %p1637_p4 }
  0x9c   : > { %1647 = shalt.err (!%p1644_p0)
}
  0x9d   : > { %s1648_s13 = scalar_lea.vmem %s1962_s1, 2048  ;;  %s1745_s18 = smov [#allocation7]  }
  0x9e   : > { %p1649_p5 = scmp.ne.s32.totalorder %s1962_s1, %s1648_s13  ;;  %s1653_s21 = sshll.u32 %s1745_s18, 4  ;;  %s1654_s21 = int_to_ptr.vmem [resolvable:$false] %s1653_s21 }
  0x9f   : > { %s1655_s3 = scalar_lea.vmem %s1654_s21, 4096  ;;  %p1656_p9 = scmp.lt.s32.totalorder %s1962_s1, %s1654_s21 }
  0xa0   : > { %p1651_p2 = pnand %p1649_p5, %p2251_p12  ;;  %p1657_p1 = scmp.lt.s32.totalorder %s1655_s3, %s1648_s13 }
  0xa2   : > { %p1652_p8 = pneg %p1651_p2  ;;  %p1658_p6 = por %p1657_p1, %p1656_p9 }
  0xa4   : > { %p1659_p11 = pnand %p1658_p6, %p1652_p8 }
  0xa6   : > { %1662 = shalt.err (!%p1659_p11)
}
  0xa7   : > { %1462 = dma.hbm_to_vmem [thread:$0]  (!%p2252_p10), %s1958_s24, 2048, %s1962_s1, %s1920_s26, %s2245_s12, %s2245_s12, %s1741_s14  }
  0xa8   : > { %p2253_p12 = scmp.ne.s32.totalorder %s2237_s19, 0 }
  0xa9   : > { %s2040_s25 = sand.u32 (!%p2253_p12), 1, %s1729_s28   ;;  %p2254_p4 = scmp.ne.s32.totalorder (!%p2253_p12), %s2232_s16, 0 }
  0xaa   : > { %360 = sbr.rel (%p2253_p12) target bundleno = 1251 (0x4e3), region = 52  ;;  %s1068_s5 = sshll.u32 (!%p2253_p12), %s2040_s25, 3 }
  0xab   : > { %s363_s8 = scalar_lea.sflag (!%p2253_p12), [#allocation3], %s2040_s25  ;;  %s2046_s29 = scalar_lea.vmem (!%p2253_p12), [#allocation2], %s1068_s5 }
  0xb1   : > { %1708 = dma.done.wait (%p2254_p4), %s363_s8, 128  }
  0xb2   : > { %1710 = vsyncadd (%p2254_p4), %s363_s8, 4294967168  ;;  %s371_s1 = sand.u32 1, %s1817_s9   ;;  %s1069_s19 = sshll.u32 %s2040_s25, 7 }
  0xb3   : > { %s372_s14 = scalar_lea.sflag [#allocation6], %s371_s1  ;;  %s2054_s26 = scalar_lea.vmem [#allocation5], %s1069_s19 }
  0xb4   : > { %1712 = dma.done.wait (%p2254_p4), %s372_s14, 4096  }
  0xb5   : > { %1714 = vsyncadd (%p2254_p4), %s372_s14, 4294963200  ;;  %s2060_s12 = scalar_lea.vmem [#allocation7], %s1069_s19  ;;  %p2255_p10 = scmp.eq.s32.totalorder %s1817_s9, 0 }
  0xb7   : > { %1716 = dma.done.wait (%p2255_p10), [#allocation9], 4096   ;;  %p2256_p13 = pmov %p2255_p10 }
  0xb8   : > { %v1746_v0 = vmov 0.0|0.0   ;;  %vm1747_vm0 = vmmov 0   ;;  %v1748_v1 = vmov 0.0   ;;  %v551_v2 = vld [vmem:[#allocation10] sm:$0xff]  ;;  %v552_v3 = vld [vmem:[#allocation10 + $0x8] sm:$0xff]  ;;  %v553_v4 = vld [vmem:[#allocation10 + $0x10] sm:$0xff] }
  0xb9   : > { %1718 = vsyncadd (%p2256_p13), [#allocation9], 4294963200  ;;  %1326 = vmatprep.subr.bf16.mxu0 %v1746_v0  ;;  %1197 = vmatprep.mubr.msk.f32.mxu0 %vm1747_vm0, %v1748_v1  ;;  %v1350_v5 = vpack.c.bf16 %v552_v3, %v551_v2  ;;  %v554_v6 = vld [vmem:[#allocation10 + $0x18] sm:$0xff]  ;;  %v555_v8 = vld [vmem:[#allocation10 + $0x20] sm:$0xff]  ;;  %s2257_s11 = sld [smem:[#allocation25_spill]]  ;;  %p438_p3 = scmp.lt.s32.totalorder %s1817_s9, 1 }
  0xba   : > { %v1354_v7 = vpack.c.bf16 %v554_v6, %v553_v4  ;;  %v556_v9 = vld [vmem:[#allocation10 + $0x28] sm:$0xff]  ;;  %v442_v11 = vld [vmem:[%s2054_s26] sm:$0xff]  ;;  %v557_v12 = vld [vmem:[#allocation10 + $0x30] sm:$0xff]  ;;  %s2258_s27 = sld [smem:[#allocation23_spill]]  ;;  %s437_s13 = scalar_lea.vmem [#allocation11], %s1068_s5 }
  0xbb   : > { %1351 = vmatprep.subr.bf16.mxu1 %v1350_v5  ;;  %v1358_v10 = vpack.c.bf16 %v556_v9, %v555_v8  ;;  %v558_v13 = vld [vmem:[#allocation10 + $0x38] sm:$0xff]  ;;  %1232 = vmatprep.mubr.f32.mxu1 %v442_v11  ;;  %v458_v14 = vld [vmem:[#allocation8] sm:$0xff]  ;;  %v459_v16 = vld [vmem:[#allocation8 + $0x8] sm:$0xff]  ;;  %s439_s20 = scalar_select %p438_p3, %s1817_s9, 1 }
  0xbc   : > { %1353 = vmatpush3.bf16.msra.mxu1 %v1350_v5  ;;  %v1362_v15 = vpack.c.bf16 %v558_v13, %v557_v12  ;;  %v460_v17 = vld [vmem:[#allocation8 + $0x10] sm:$0xff]  ;;  %v461_v18 = vld [vmem:[#allocation8 + $0x18] sm:$0xff]  ;;  %v559_v19 = vld [vmem:[#allocation10 + $0x40] sm:$0xff]  ;;  %v1327_v21 = vpack.c.bf16 %v459_v16, %v458_v14  ;;  %s2259_s4 = sld [smem:[#allocation20_spill]]  ;;  %s913_s18 = sshll.u32 %s437_s13, 4  ;;  %s2143_s18 = int_to_ptr.vmem [resolvable:$true] %s913_s18 }
  0xbd   : > { %1355 = vmatprep.subr.bf16.mxu1 %v1354_v7  ;;  %v560_v20 = vld [vmem:[#allocation10 + $0x48] sm:$0xff]  ;;  %v1330_v22 = vpack.c.bf16 %v461_v18, %v460_v17  ;;  %v462_v24 = vld [vmem:[#allocation8 + $0x20] sm:$0xff]  ;;  %v561_v26 = vld [vmem:[#allocation10 + $0x50] sm:$0xff]  ;;  %s1077_s21 = sshll.u32 %s1817_s9, 7  ;;  %s900_s14 = scalar_lea.sflag [#allocation4], %s2040_s25 }
  0xbe   : > { %1328 = vmatpush3.bf16.msra.mxu0 %v1327_v21  ;;  %v1366_v23 = vpack.c.bf16 %v560_v20, %v559_v19  ;;  %v463_v25 = vld [vmem:[#allocation8 + $0x28] sm:$0xff]  ;;  %v562_v27 = vld [vmem:[#allocation10 + $0x58] sm:$0xff]  ;;  %v464_v30 = vld [vmem:[#allocation8 + $0x30] sm:$0xff]  ;;  %s1750_s9 = smov [#allocation11]  }
  0xbf   : > { %1329 = vmatprep.subr.bf16.mxu0 %v1746_v0  ;;  %v1333_v28 = vpack.c.bf16 %v463_v25, %v462_v24  ;;  %v1370_v29 = vpack.c.bf16 %v562_v27, %v561_v26  ;;  %v465_v31 = vld [vmem:[#allocation8 + $0x38] sm:$0xff]  ;;  %v563_v32 = vld [vmem:[#allocation10 + $0x60] sm:$0xff]  ;;  %v564_v33 = vld [vmem:[#allocation10 + $0x68] sm:$0xff]  ;;  %s1667_s5 = sshll.u32 %s1750_s9, 4  ;;  %s1668_s5 = int_to_ptr.vmem [resolvable:$false] %s1667_s5 }
  0xc0   : > { %1357 = vmatpush3.bf16.msra.mxu1 %v1354_v7  ;;  %v1336_v34 = vpack.c.bf16 %v465_v31, %v464_v30  ;;  %v1374_v35 = vpack.c.bf16 %v564_v33, %v563_v32  ;;  %v466_v36 = vld [vmem:[#allocation8 + $0x40] sm:$0xff]  ;;  %v467_v37 = vld [vmem:[#allocation8 + $0x48] sm:$0xff]  ;;  %v565_v38 = vld [vmem:[#allocation10 + $0x70] sm:$0xff]  ;;  %s440_s15 = scalar_lea.vmem %s2258_s27, %s439_s20  ;;  %p1670_p8 = scmp.lt.s32.totalorder %s2143_s18, %s1668_s5 }
  0xc1   : > { %1359 = vmatprep.subr.bf16.mxu1 %v1358_v10  ;;  %v566_v39 = vld [vmem:[#allocation10 + $0x78] sm:$0xff]  ;;  %v1339_v40 = vpack.c.bf16 %v467_v37, %v466_v36  ;;  %v468_v42 = vld [vmem:[#allocation8 + $0x50] sm:$0xff]  ;;  %v470_v45 = vld [vmem:[#allocation8 + $0x60] sm:$0xff] }
  0xc2   : > { %1331 = vmatpush3.bf16.msra.mxu0 %v1330_v22  ;;  %v1378_v41 = vpack.c.bf16 %v566_v39, %v565_v38  ;;  %v469_v43 = vld [vmem:[#allocation8 + $0x58] sm:$0xff]  ;;  %v471_v46 = vld [vmem:[#allocation8 + $0x68] sm:$0xff]  ;;  %v444_v49 = vld [vmem:[%s2054_s26 + $0x10] sm:$0xff]  ;;  %p2262_p0 = scmp.ne.s32.totalorder %s2259_s4, 0 }
  0xc3   : > { %1332 = vmatprep.subr.bf16.mxu0 %v1746_v0  ;;  %v1342_v44 = vpack.c.bf16 %v469_v43, %v468_v42  ;;  %v443_v47 = vld [vmem:[%s2054_s26 + $0x8] sm:$0xff]  ;;  %v1345_v48 = vpack.c.bf16 %v471_v46, %v470_v45  ;;  %v472_v50 = vld [vmem:[#allocation8 + $0x70] sm:$0xff]  ;;  %v473_v51 = vld [vmem:[#allocation8 + $0x78] sm:$0xff] }
  0xc4   : > { %1361 = vmatpush3.bf16.msra.mxu1 %v1358_v10  ;;  %v445_v52 = vld [vmem:[%s2054_s26 + $0x18] sm:$0xff]  ;;  %v1348_v53 = vpack.c.bf16 %v473_v51, %v472_v50  ;;  %v446_v54 = vld [vmem:[%s2054_s26 + $0x20] sm:$0xff]  ;;  %v447_v55 = vld [vmem:[%s2054_s26 + $0x28] sm:$0xff]  ;;  %v793_v50 = vlaneseq }
  0xc5   : > { %1363 = vmatprep.subr.bf16.mxu1 %v1362_v15  ;;  %v441_v56 = vld [vmem:[%s2046_s29] sm:$0xff]  ;;  %v450_v59 = vld [vmem:[%s2054_s26 + $0x40] sm:$0xff]  ;;  %v451_v60 = vld [vmem:[%s2054_s26 + $0x48] sm:$0xff]  ;;  %s2260_s29 = sld [smem:[#allocation26_spill]] }
  0xc6   : > { %1334 = vmatpush3.bf16.msra.mxu0 %v1333_v28  ;;  %v448_v57 = vld [vmem:[%s2054_s26 + $0x30] sm:$0xff]  ;;  %v449_v58 = vld [vmem:[%s2054_s26 + $0x38] sm:$0xff]  ;;  %v454_v63 = vld [vmem:[%s2054_s26 + $0x60] sm:$0xff] }
  0xc7   : > { %1335 = vmatprep.subr.bf16.mxu0 %v1746_v0  ;;  %v452_v61 = vld [vmem:[%s2054_s26 + $0x50] sm:$0xff]  ;;  %v453_v62 = vld [vmem:[%s2054_s26 + $0x58] sm:$0xff]  ;;  %v455_v2 = vld [vmem:[%s2054_s26 + $0x68] sm:$0xff] }
  0xc8   : > { %1365 = vmatpush3.bf16.msra.mxu1 %v1362_v15  ;;  %v456_v3 = vld [vmem:[%s2054_s26 + $0x70] sm:$0xff]  ;;  %v457_v4 = vld [vmem:[%s2054_s26 + $0x78] sm:$0xff]  ;;  %s1663_s26 = scalar_lea.vmem %s2143_s18, 128 }
  0xc9   : > { %1367 = vmatprep.subr.bf16.mxu1 %v1366_v23  ;;  %v1075_v5 = vld [vmem:[%s2197_s7] ss:$0 sm:$0xff]  ;;  %p1664_p7 = scmp.ne.s32.totalorder %s2143_s18, %s1663_s26 }
  0xca   : > { %1337 = vmatpush3.bf16.msra.mxu0 %v1336_v34  ;;  %v790_v51 = vld [vmem:[%s440_s15] sm:$0x1] }
  0xcb   : > { %1338 = vmatprep.subr.bf16.mxu0 %v1746_v0  ;;  %vm791_vm1 = vcmp.ne.s32.totalorder %v790_v51, 0  ;;  %s2261_s1 = smov %s2260_s29  ;;  %s2148_s19 = scalar_lea.hbm %s2260_s29, %s1077_s21 }
  0xcc   : > { %1369 = vmatpush3.bf16.msra.mxu1 %v1366_v23  ;;  %p1665_p5 = pnand %p1664_p7, %p2262_p0 }
  0xcd   : > { %1371 = vmatprep.subr.bf16.mxu1 %v1370_v29 }
  0xce   : > { %1340 = vmatpush3.bf16.msra.mxu0 %v1339_v40  ;;  %p1666_p2 = pneg %p1665_p5 }
  0xcf   : > { %1341 = vmatprep.subr.bf16.mxu0 %v1746_v0 }
  0xd0   : > { %1373 = vmatpush3.bf16.msra.mxu1 %v1370_v29 }
  0xd1   : > { %1375 = vmatprep.subr.bf16.mxu1 %v1374_v35 }
  0xd2   : > { %1343 = vmatpush3.bf16.msra.mxu0 %v1342_v44 }
  0xd3   : > { %1344 = vmatprep.subr.bf16.mxu0 %v1746_v0 }
  0xd4   : > { %1377 = vmatpush3.bf16.msra.mxu1 %v1374_v35 }
  0xd5   : > { %1379 = vmatprep.subr.bf16.mxu1 %v1378_v41 }
  0xd6   : > { %1346 = vmatpush3.bf16.msra.mxu0 %v1345_v48 }
  0xd7   : > { %1347 = vmatprep.subr.bf16.mxu0 %v1746_v0 }
  0xd8   : > { %1381 = vmatpush3.bf16.msra.mxu1 %v1378_v41 }
  0xd9   : > { %1406 = vmatprep.subr.bf16.mxu1 %v1746_v0 }
  0xda   : > { %1349 = vmatpush3.bf16.msra.mxu0 %v1348_v53 }
  0xdb   : > { %1233 = vmatmul.mubr.f32.vlgmr.msra.gmra.mrb[0].mxu1 %v443_v47  ;;  %1382 = vmatprep.subr.bf16.mxu0 %v1746_v0  ;;  %v1074_v47 = vld [vmem:[%s2257_s11] ss:$0 sm:$0xff] }
  0xdc   : > { %1235 = vmatprep.mubr.f32.mxu1 %v444_v49 }
  0xdd   : > { %1198 = vmatmul.mubr.f32.vlgmr.msra.gmra.mrb[0].mxu0 %v441_v56 }
  0xde   : > { %1288 = vmatprep.mubr.msk.f32.mxu0 %vm1747_vm0, %v1748_v1 }
  0xdf   : > { %1236 = vmatmul.mubr.f32.gmra.mrb[2].mxu1 %v445_v52  ;;  %v794_v52 = vshrl.u32 %v793_v50, 7 }
  0xe0   : > { %1238 = vmatprep.mubr.f32.mxu1 %v446_v54  ;;  %v1749_v54 = vmov 0  }
  0xe1   : > { %v795_v53 = vsub.s32 0, %v794_v52 }
  0xe3   : > { %1239 = vmatmul.mubr.f32.gmra.mrb[4].mxu1 %v447_v55  ;;  %v792_v55 = vsel %vm791_vm1, 1, %v1749_v54 }
  0xe4   : > { %1241 = vmatprep.mubr.f32.mxu1 %v448_v57  ;;  %v796_v56 = vrot.slane %v792_v55, %v795_v53  ;;  %v800_v57 = vand.u32 127, %v793_v50 }
  0xe6   : > { %vm797_vm2 = vcmp.eq.s32.totalorder %v796_v56, 1  ;;  %vm801_vm3 = vcmp.lt.s32.totalorder %v800_v57, 8 }
  0xe7   : > { %1242 = vmatmul.mubr.f32.gmra.mrb[6].mxu1 %v449_v58 }
  0xe8   : > { %1244 = vmatprep.mubr.f32.mxu1 %v450_v59 }
  0xeb   : > { %1245 = vmatmul.mubr.f32.gmra.mrb[8].mxu1 %v451_v60 }
  0xec   : > { %1247 = vmatprep.mubr.f32.mxu1 %v452_v61 }
  0xef   : > { %1248 = vmatmul.mubr.f32.gmra.mrb[10].mxu1 %v453_v62  ;;  %v812_v62 = vld [vmem:[%s2060_s12] sm:$0xff] }
  0xf0   : > { %1250 = vmatprep.mubr.f32.mxu1 %v454_v63  ;;  %v813_v63 = vld [vmem:[%s2060_s12 + $0x8] sm:$0xff] }
  0xf3   : > { %1251 = vmatmul.mubr.f32.gmra.mrb[12].mxu1 %v455_v2  ;;  %v814_v2 = vld [vmem:[%s2060_s12 + $0x10] sm:$0xff] }
  0xf4   : > { %1253 = vmatprep.mubr.f32.mxu1 %v456_v3  ;;  %v1407_v3 = vpack.c.bf16 %v813_v63, %v812_v62 }
  0xf6   : > { %1408 = vmatpush3.bf16.msra.mxu1 %v1407_v3 }
  0xf7   : > { %1254 = vmatmul.mubr.f32.gmra.mrb[14].mxu1 %v457_v4  ;;  %v815_v4 = vld [vmem:[%s2060_s12 + $0x18] sm:$0xff]  ;;  %1409 = vmatprep.subr.bf16.mxu1 %v1746_v0 }
  0xf8   : > { %1323 = vmatprep.mubr.msk.f32.mxu1 %vm1747_vm0, %v1748_v1 }
 0x1ae   : > { %v1234_v6 = vpop.f32.mrb[0].mxu1 }
 0x1af   : > { %v646_v7 = vadd.f32 %v1234_v6, %v1075_v5  ;;  %v640_v8 = vpop.f32.mrb[1].mxu1  ;;  %v816_v6 = vld [vmem:[%s2060_s12 + $0x20] sm:$0xff] }
 0x1b0   : > { %v641_v9 = vadd.f32 %v1075_v5, %v640_v8  ;;  %v547_v17 = vpop.f32.mrb[0].mxu0 }
 0x1b1   : > { %v1199_v19 = vpop.f32.mrb[1].mxu0  ;;  %v548_v48 = vadd.f32 %v1074_v47, %v547_v17 }
 0x1b2   : > { %v1383_v10 = vpack.c.bf16 %v646_v7, %v641_v9  ;;  %v1237_v11 = vpop.f32.mrb[2].mxu1  ;;  %v817_v7 = vld [vmem:[%s2060_s12 + $0x28] sm:$0xff]  ;;  %v818_v9 = vld [vmem:[%s2060_s12 + $0x30] sm:$0xff]  ;;  %v823_v19 = vld [vmem:[%s2060_s12 + $0x58] sm:$0xff] }
 0x1b3   : > { %v656_v12 = vadd.f32 %v1237_v11, %v1075_v5  ;;  %v650_v13 = vpop.f32.mrb[3].mxu1  ;;  %v719_v49 = vmul.f32 0.25, %v548_v48  ;;  %v1413_v8 = vpack.c.bf16 %v817_v7, %v816_v6 }
 0x1b4   : > { %1384 = vmatpush3.bf16.xpose.msra.mxu0 %v1383_v10  ;;  %v651_v14 = vadd.f32 %v1075_v5, %v650_v13  ;;  %v819_v10 = vld [vmem:[%s2060_s12 + $0x38] sm:$0xff]  ;;  %v821_v13 = vld [vmem:[%s2060_s12 + $0x48] sm:$0xff] }
 0x1b5   : > { %1385 = vmatprep.subr.bf16.mxu0 %v1746_v0  ;;  %v1416_v11 = vpack.c.bf16 %v819_v10, %v818_v9 }
 0x1b6   : > { %v1386_v15 = vpack.c.bf16 %v656_v12, %v651_v14  ;;  %v1240_v16 = vpop.f32.mrb[4].mxu1  ;;  %v820_v12 = vld [vmem:[%s2060_s12 + $0x40] sm:$0xff] }
 0x1b7   : > { %v666_v1 = vadd.f32 %v1240_v16, %v1075_v5  ;;  %v660_v18 = vpop.f32.mrb[5].mxu1  ;;  %v1419_v14 = vpack.c.bf16 %v821_v13, %v820_v12 }
 0x1b8   : > { %v661_v20 = vadd.f32 %v1075_v5, %v660_v18  ;;  %v822_v18 = vld [vmem:[%s2060_s12 + $0x50] sm:$0xff] }
 0x1ba   : > { %v1389_v21 = vpack.c.bf16 %v666_v1, %v661_v20  ;;  %v1243_v22 = vpop.f32.mrb[6].mxu1  ;;  %v1422_v20 = vpack.c.bf16 %v823_v19, %v822_v18 }
 0x1bb   : > { %v676_v23 = vadd.f32 %v1243_v22, %v1075_v5  ;;  %v670_v24 = vpop.f32.mrb[7].mxu1  ;;  %v825_v22 = vld [vmem:[%s2060_s12 + $0x68] sm:$0xff] }
 0x1bc   : > { %1387 = vmatpush3.bf16.xpose.msra.mxu0 %v1386_v15  ;;  %v671_v25 = vadd.f32 %v1075_v5, %v670_v24  ;;  %v826_v24 = vld [vmem:[%s2060_s12 + $0x70] sm:$0xff] }
 0x1bd   : > { %1388 = vmatprep.subr.bf16.mxu0 %v1746_v0 }
 0x1be   : > { %v1392_v26 = vpack.c.bf16 %v676_v23, %v671_v25  ;;  %v1246_v27 = vpop.f32.mrb[8].mxu1  ;;  %v827_v25 = vld [vmem:[%s2060_s12 + $0x78] sm:$0xff] }
 0x1bf   : > { %v686_v28 = vadd.f32 %v1246_v27, %v1075_v5  ;;  %v680_v29 = vpop.f32.mrb[9].mxu1 }
 0x1c0   : > { %v681_v30 = vadd.f32 %v1075_v5, %v680_v29 }
 0x1c2   : > { %v1395_v31 = vpack.c.bf16 %v686_v28, %v681_v30  ;;  %v1249_v32 = vpop.f32.mrb[10].mxu1 }
 0x1c3   : > { %v696_v33 = vadd.f32 %v1249_v32, %v1075_v5  ;;  %v690_v34 = vpop.f32.mrb[11].mxu1 }
 0x1c4   : > { %1390 = vmatpush3.bf16.xpose.msra.mxu0 %v1389_v21  ;;  %v691_v35 = vadd.f32 %v1075_v5, %v690_v34  ;;  %v824_v21 = vld [vmem:[%s2060_s12 + $0x60] sm:$0xff]  ;;  %s1669_s12 = scalar_lea.vmem %s1668_s5, 256 }
 0x1c5   : > { %1391 = vmatprep.subr.bf16.mxu0 %v1746_v0  ;;  %v1425_v23 = vpack.c.bf16 %v825_v22, %v824_v21  ;;  %p1671_p9 = scmp.lt.s32.totalorder %s1669_s12, %s1663_s26 }
 0x1c6   : > { %v1398_v36 = vpack.c.bf16 %v696_v33, %v691_v35  ;;  %v1252_v37 = vpop.f32.mrb[12].mxu1 }
 0x1c7   : > { %v706_v38 = vadd.f32 %v1252_v37, %v1075_v5  ;;  %v700_v39 = vpop.f32.mrb[13].mxu1  ;;  %p1672_p1 = por %p1671_p9, %p1670_p8 }
 0x1c8   : > { %v701_v40 = vadd.f32 %v1075_v5, %v700_v39 }
 0x1c9   : > { %p1673_p6 = pnand %p1672_p1, %p1666_p2 }
 0x1ca   : > { %v1401_v41 = vpack.c.bf16 %v706_v38, %v701_v40  ;;  %v1255_v42 = vpop.f32.mrb[14].mxu1 }
 0x1cb   : > { %v716_v43 = vadd.f32 %v1255_v42, %v1075_v5  ;;  %v710_v44 = vpop.f32.mrb[15].mxu1 }
 0x1cc   : > { %1393 = vmatpush3.bf16.xpose.msra.mxu0 %v1392_v26  ;;  %v711_v45 = vadd.f32 %v1075_v5, %v710_v44  ;;  %v1410_v5 = vpack.c.bf16 %v815_v4, %v814_v2  ;;  %v1428_v26 = vpack.c.bf16 %v827_v25, %v826_v24 }
 0x1cd   : > { %1394 = vmatprep.subr.bf16.mxu0 %v1746_v0 }
 0x1ce   : > { %v1404_v46 = vpack.c.bf16 %v716_v43, %v711_v45  ;;  %1411 = vmatpush3.bf16.msra.mxu1 %v1410_v5 }
 0x1cf   : > { %1412 = vmatprep.subr.bf16.mxu1 %v1746_v0 }
 0x1d2   : > { %1414 = vmatpush3.bf16.msra.mxu1 %v1413_v8 }
 0x1d3   : > { %1415 = vmatprep.subr.bf16.mxu1 %v1746_v0 }
 0x1d4   : > { %1396 = vmatpush3.bf16.xpose.msra.mxu0 %v1395_v31 }
 0x1d5   : > { %1397 = vmatprep.subr.bf16.mxu0 %v1746_v0 }
 0x1d6   : > { %1417 = vmatpush3.bf16.msra.mxu1 %v1416_v11 }
 0x1d7   : > { %1418 = vmatprep.subr.bf16.mxu1 %v1746_v0 }
 0x1da   : > { %1420 = vmatpush3.bf16.msra.mxu1 %v1419_v14 }
 0x1db   : > { %1421 = vmatprep.subr.bf16.mxu1 %v1746_v0 }
 0x1dc   : > { %1399 = vmatpush3.bf16.xpose.msra.mxu0 %v1398_v36 }
 0x1dd   : > { %1400 = vmatprep.subr.bf16.mxu0 %v1746_v0 }
 0x1de   : > { %1423 = vmatpush3.bf16.msra.mxu1 %v1422_v20 }
 0x1df   : > { %1424 = vmatprep.subr.bf16.mxu1 %v1746_v0 }
 0x1e2   : > { %1426 = vmatpush3.bf16.msra.mxu1 %v1425_v23 }
 0x1e3   : > { %1427 = vmatprep.subr.bf16.mxu1 %v1746_v0 }
 0x1e4   : > { %1402 = vmatpush3.bf16.xpose.msra.mxu0 %v1401_v41 }
 0x1e5   : > { %1403 = vmatprep.subr.bf16.mxu0 %v1746_v0 }
 0x1e6   : > { %1429 = vmatpush3.bf16.msra.mxu1 %v1428_v26 }
 0x1ec   : > { %1405 = vmatpush3.bf16.xpose.msra.mxu0 %v1404_v46 }
 0x1f3   : > { %1289 = vmatmul.mubr.f32.vlgmr.msra.gmra.mrb[2].mxu0 %v719_v49 }
 0x2c6   : > { %v786_v58 = vpop.f32.mrb[2].mxu0 }
 0x2c7   : > { %v798_v59 = vsel %vm797_vm2, %v786_v58, -1e+09  ;;  %v1290_v60 = vpop.f32.mrb[3].mxu0 }
 0x2c8   : > { %v802_v61 = vsel %vm801_vm3, %v798_v59, -inf }
 0x2c9   : > { %803 = vmax.xlane.f32.xlu0 %v802_v61 }
 0x356   : > { %v804_v15 = vpop.xlane.xlu0 %803 }
 0x357   : > { %v805_v16 = vsub.f32 %v802_v61, %v804_v15 }
 0x359   : > { %v806_v17 = vmul.f32 1.442695, %v805_v16 }
 0x35b   : > { %1513 = vpow2.f32 %v806_v17 }
 0x365   : > { %v1514_v1 = vpop.eup %1513 }
 0x366   : > { %808 = vadd.xlane.f32.xlu0 %v1514_v1 }
 0x3f3   : > { %v809_v27 = vpop.xlane.xlu0 %808 }
 0x3f4   : > { %1515 = vrcp.f32 %v809_v27 }
 0x3fe   : > { %v1516_v28 = vpop.eup %1515 }
 0x3ff   : > { %v811_v29 = vmul.f32 %v1516_v28, %v1514_v1 }
 0x401   : > { %1324 = vmatmul.mubr.f32.vlgmr.msra.gmra.mrb[16].mxu1 %v811_v29 }
 0x4d4   : > { %v894_v0 = vpop.f32.mrb[16].mxu1 }
 0x4d5   : > { %898 = vst [vmem:[%s437_s13] sm:$0xff] %v894_v0  ;;  %v1325_v30 = vpop.f32.mrb[17].mxu1 }
 0x4d6   : > { %1676 = shalt.err (!%p1673_p6)
}
 0x4d7   : > { %s1677_s25 = scalar_lea.hbm %s2148_s19, 128  ;;  %s1681_s23 = scalar_lea.hbm %s2261_s1, 256 }
 0x4d8   : > { %p1678_p11 = scmp.ne.s32.totalorder %s2148_s19, %s1677_s25  ;;  %p1682_p10 = scmp.lt.u32.totalorder %s2148_s19, %s2261_s1 }
 0x4d9   : > { %p1683_p13 = scmp.lt.u32.totalorder %s1681_s23, %s1677_s25  ;;  %p1685_p7 = scmp.lt.u32.totalorder %s1677_s25, %s2148_s19 }
 0x4da   : > { %p1679_p12 = pnand %p1678_p11, %p2262_p0 }
 0x4db   : > { %p1684_p3 = por %p1683_p13, %p1682_p10 }
 0x4dc   : > { %p1680_p4 = pneg %p1679_p12 }
 0x4dd   : > { %p1686_p5 = por %p1685_p7, %p1684_p3 }
 0x4df   : > { %p1687_p2 = pnand %p1686_p5, %p1680_p4 }
 0x4e1   : > { %1690 = shalt.err (!%p1687_p2)
}
 0x4e2   : > { %1444 = dma.vmem_to_hbm [thread:$0]  (%p2262_p0), %s2143_s18, 128, %s2148_s19, %s900_s14  }
 0x4e3 PF: > { %s2263_s20 = sld [smem:[#allocation16_spill]]  ;;  %s2264_s22 = sld [smem:[#allocation21_spill]] }
 0x4e4   : > { %p2266_p9 = scmp.ge.s32.totalorder %s1737_s30, 2 }
 0x4e9   : > { %s925_s10 = sand.u32 1, %s2263_s20   ;;  %p2265_p8 = scmp.ne.s32.totalorder %s2264_s22, 0 }
 0x4ea   : > { %s926_s27 = scalar_lea.sflag [#allocation4], %s925_s10 }
 0x4eb   : > { %p1464_p1 = pnand %p2266_p9, %p2265_p8 }
 0x4ed   : > { %1720 = dma.done.wait (!%p1464_p1), %s926_s27, 128  }
 0x4ee   : > { %1722 = vsyncadd (!%p1464_p1), %s926_s27, 4294967168  ;;  %s2267_s30 = sld [smem:[#allocation18_spill]]  ;;  %s2268_s15 = sld [smem:[#allocation17_spill]] }
 0x4ef   : > { %s2269_s29 = sld [smem:[#allocation19_spill]]  ;;  %s2270_s27 = smov %s1729_s28 }
 0x4f4   : > { %p25_p6 = scmp.ge.s32.totalorder %s2267_s30, 4   ;;  %s2271_s28 = smov %s2268_s15 }
 0x4f6   :  { %27 = sbr.rel (!%p25_p6) target bundleno = 14 (0xe), region = 132 }
 0x4fd   :  { %931 = vsyncpa [#allocation3], 1 }
 0x4fe   :  { %933 = vsyncpa [#allocation3 + $0x1], 1 }
 0x4ff   :  { %934 = vsyncpa [#allocation6], 1 }
 0x500   :  { %936 = vsyncpa [#allocation6 + $0x1], 1 }
 0x501   :  { %937 = vsyncpa [#allocation9], 1 }
 0x502   :  { %938 = vsyncpa [#allocation4], 1 }
 0x503   :  { %940 = vsyncpa [#allocation4 + $0x1], 1 }

</bundles_post_ra>
